<compile_context>
chip_gen: v5e
topology: v5e:2x2
jax: 0.10.0
libtpu: 0.0.40
codegen_flags: <defaults>
</compile_context>

<pallas_src>
import functools

import jax
import jax.numpy as jnp
from jax.experimental import pallas as pl
from jax.experimental.pallas import tpu as pltpu


# ----------------------------------------------------------------------------
# Tiling / compiler-parameter helpers
# ----------------------------------------------------------------------------
def _round_up(x, m):
    return ((x + m - 1) // m) * m


def _pick_tile(dim, unit, cap):
    """Return (tile, padded_dim): tile is a multiple of `unit`, <= cap, and
    divides padded_dim (padded_dim = dim rounded up to a multiple of `unit`)."""
    p = _round_up(dim, unit)
    if p <= cap:
        return p, p
    best = unit
    t = unit
    while t <= cap:
        if p % t == 0:
            best = t
        t += unit
    return best, p


def _compute_vmem_limit():
    # Generation-aware VMEM ceiling: ~3/4 of physical per-core VMEM, capped at
    # 96 MiB (v5e/v6e: 128 MiB physical -> 96 MiB; v7x: 64 MiB -> 48 MiB).
    cap = 64 * 1024 * 1024  # conservative fallback (safe on every generation)
    try:
        info = pltpu.get_tpu_info()
        cap = int(getattr(info, "vmem_capacity_bytes", cap))
    except Exception:
        pass
    return int(min(96 * 1024 * 1024, (cap * 3) // 4))


_VMEM_LIMIT = _compute_vmem_limit()
# Bigger output tiles when VMEM is plentiful (v5e/v6e); smaller on v7x.
_MN_CAP = 512 if _VMEM_LIMIT >= 80 * 1024 * 1024 else 256
_K_CAP = 512

_COMPILER_PARAMS_MM = pltpu.CompilerParams(
    dimension_semantics=("parallel", "parallel", "arbitrary"),
    vmem_limit_bytes=_VMEM_LIMIT,
)
_COMPILER_PARAMS_MLP = pltpu.CompilerParams(
    dimension_semantics=("parallel",),
    vmem_limit_bytes=_VMEM_LIMIT,
)


# ----------------------------------------------------------------------------
# Pallas kernels
# ----------------------------------------------------------------------------
def _matmul_bn_kernel(*refs, relu, has_residual):
    """Tiled  out = relu((A @ B) * scale + shift [+ residual])  with f32
    accumulation over the K grid axis (axis 2)."""
    if has_residual:
        a_ref, b_ref, s_ref, t_ref, r_ref, o_ref, acc_ref = refs
    else:
        a_ref, b_ref, s_ref, t_ref, o_ref, acc_ref = refs
        r_ref = None

    k = pl.program_id(2)

    @pl.when(k == 0)
    def _init():
        acc_ref[...] = jnp.zeros_like(acc_ref)

    acc_ref[...] += jnp.dot(a_ref[...], b_ref[...],
                            preferred_element_type=jnp.float32)

    @pl.when(k == pl.num_programs(2) - 1)
    def _finalize():
        acc = acc_ref[...] * s_ref[...] + t_ref[...]
        if has_residual:
            acc = acc + r_ref[...].astype(jnp.float32)
        if relu:
            acc = jnp.maximum(acc, 0.0)
        o_ref[...] = acc.astype(o_ref.dtype)


def _mlp_kernel(h_ref, w1_ref, b1_ref, w2_ref, b2_ref, o_ref):
    """Projection head: z = relu(h @ W1 + b1) @ W2 + b2 (single fused kernel,
    bf16 MXU operands, f32 epilogue)."""
    x = jnp.dot(h_ref[...], w1_ref[...],
                preferred_element_type=jnp.float32) + b1_ref[...]
    x = jnp.maximum(x, 0.0).astype(jnp.bfloat16)
    z = jnp.dot(x, w2_ref[...],
                preferred_element_type=jnp.float32) + b2_ref[...]
    o_ref[...] = z.astype(o_ref.dtype)


# ----------------------------------------------------------------------------
# Fused matmul wrapper (tiling, padding, epilogue fusion)
# ----------------------------------------------------------------------------
def matmul_bn(a, b, scale, shift, residual=None, relu=True,
              out_dtype=jnp.bfloat16):
    """a: [M, K], b: [K, N], scale/shift: [1, N], residual: [M, N] or None.
    Returns [M, N] in `out_dtype`."""
    M, K = a.shape
    K2, N = b.shape
    assert K == K2

    tm, Mp = _pick_tile(M, 8, _MN_CAP)
    tk, Kp = _pick_tile(K, 128, _K_CAP)
    tn, Np = _pick_tile(N, 128, _MN_CAP)

    a = jnp.pad(a.astype(jnp.bfloat16), ((0, Mp - M), (0, Kp - K)))
    b = jnp.pad(b.astype(jnp.bfloat16), ((0, Kp - K), (0, Np - N)))
    scale = jnp.pad(scale.astype(jnp.float32), ((0, 0), (0, Np - N)))
    shift = jnp.pad(shift.astype(jnp.float32), ((0, 0), (0, Np - N)))

    has_res = residual is not None
    inputs = [a, b, scale, shift]
    in_specs = [
        pl.BlockSpec((tm, tk), lambda i, j, k: (i, k)),
        pl.BlockSpec((tk, tn), lambda i, j, k: (k, j)),
        pl.BlockSpec((1, tn), lambda i, j, k: (0, j)),
        pl.BlockSpec((1, tn), lambda i, j, k: (0, j)),
    ]
    if has_res:
        r = jnp.pad(residual.astype(jnp.bfloat16), ((0, Mp - M), (0, Np - N)))
        inputs.append(r)
        in_specs.append(pl.BlockSpec((tm, tn), lambda i, j, k: (i, j)))

    grid = (Mp // tm, Np // tn, Kp // tk)
    out = pl.pallas_call(
        functools.partial(_matmul_bn_kernel, relu=relu, has_residual=has_res),
        out_shape=jax.ShapeDtypeStruct((Mp, Np), out_dtype),
        grid_spec=pltpu.PrefetchScalarGridSpec(
            num_scalar_prefetch=0,
            grid=grid,
            in_specs=in_specs,
            out_specs=pl.BlockSpec((tm, tn), lambda i, j, k: (i, j)),
            scratch_shapes=[pltpu.VMEM((tm, tn), jnp.float32)],
        ),
        compiler_params=_COMPILER_PARAMS_MM,
    )(*inputs)

    if Mp != M or Np != N:
        out = out[:M, :N]
    return out


# ----------------------------------------------------------------------------
# Conv / BN / pooling helpers (im2col glue in JAX, matmul in Pallas)
# ----------------------------------------------------------------------------
def bn_fold(bn, eps=1e-5):
    """Eval-mode BatchNorm folded into per-channel scale/shift."""
    scale = bn["gamma"] / jnp.sqrt(bn["var"] + eps)
    shift = bn["beta"] - bn["mean"] * scale
    return scale.reshape(1, -1), shift.reshape(1, -1)


def conv2d_bn(x, w, scale, shift, stride, padding, relu, residual=None):
    """x: NHWC bf16 (channels may be zero-padded past the weight's Cin),
    w: torch layout [Cout, Cin, KH, KW].  Output NHWC bf16 with channels
    padded up to a multiple of 128 (lane-dense); padded channels are zero."""
    B, H, W, Cx = x.shape
    Cout, Cin, KH, KW = w.shape
    assert Cx >= Cin
    if Cx > Cin:  # input carries zero-padded channels -> zero-pad weights too
        w = jnp.pad(w, ((0, 0), (0, Cx - Cin), (0, 0), (0, 0)))

    xp = jnp.pad(x, ((0, 0), (padding, padding), (padding, padding), (0, 0)))
    Hp, Wp = H + 2 * padding, W + 2 * padding
    OH = (Hp - KH) // stride + 1
    OW = (Wp - KW) // stride + 1

    patches = []
    for kh in range(KH):
        for kw in range(KW):
            patches.append(
                xp[:, kh:kh + stride * OH:stride, kw:kw + stride * OW:stride, :]
            )
    a = jnp.stack(patches, axis=3).reshape(B * OH * OW, KH * KW * Cx)
    wmat = jnp.transpose(w, (2, 3, 1, 0)).reshape(KH * KW * Cx, Cout)

    # Lane-dense output channels (padded channels get scale=0/shift=0 -> zero).
    Np = _round_up(Cout, 128)
    if Np != Cout:
        wmat = jnp.pad(wmat, ((0, 0), (0, Np - Cout)))
        scale = jnp.pad(scale, ((0, 0), (0, Np - Cout)))
        shift = jnp.pad(shift, ((0, 0), (0, Np - Cout)))

    res2d = None
    if residual is not None:
        assert residual.shape[:3] == (B, OH, OW) and residual.shape[3] == Np
        res2d = residual.reshape(B * OH * OW, Np)

    out = matmul_bn(a, wmat, scale, shift, residual=res2d, relu=relu)
    return out.reshape(B, OH, OW, Np)


def max_pool_3x3_s2(x):
    return jax.lax.reduce_window(
        x, jnp.array(-jnp.inf, x.dtype), jax.lax.max,
        window_dimensions=(1, 3, 3, 1),
        window_strides=(1, 2, 2, 1),
        padding=((0, 0), (1, 1), (1, 1), (0, 0)),
    )


# ----------------------------------------------------------------------------
# ResNet-18 encoder + SimCLR forward
# ----------------------------------------------------------------------------
def basic_block(x, blk):
    s1, t1 = bn_fold(blk["bn1"])
    out = conv2d_bn(x, blk["conv1"], s1, t1,
                    stride=blk["stride"], padding=1, relu=True)
    if "down_conv" in blk:
        sd, td = bn_fold(blk["down_bn"])
        identity = conv2d_bn(x, blk["down_conv"], sd, td,
                             stride=blk["stride"], padding=0, relu=False)
    else:
        identity = x
    s2, t2 = bn_fold(blk["bn2"])
    # Residual add + final ReLU fused into the second conv's kernel epilogue.
    return conv2d_bn(out, blk["conv2"], s2, t2,
                     stride=1, padding=1, relu=True, residual=identity)


def encoder_forward(params, x_nchw):
    """ResNet-18 with fc = Identity. x_nchw: [B, 3, H, W] -> h: [B, 512] f32."""
    x = jnp.transpose(x_nchw, (0, 2, 3, 1)).astype(jnp.bfloat16)  # NCHW -> NHWC
    s, t = bn_fold(params["bn1"])
    x = conv2d_bn(x, params["conv1"], s, t, stride=2, padding=3, relu=True)
    x = max_pool_3x3_s2(x)
    for blocks in params["layers"]:
        for blk in blocks:
            x = basic_block(x, blk)
    # Adaptive avg-pool (1,1) + flatten; drop any channel padding (512 = none).
    h = jnp.mean(x[..., :512].astype(jnp.float32), axis=(1, 2))
    return h


def proj_head_forward(proj, h):
    """h: [B, F] -> z: [B, out_dim] (Linear -> ReLU -> Linear fused)."""
    B, F = h.shape
    w1 = proj["w1"].astype(jnp.bfloat16)             # [F, F]
    b1 = proj["b1"].reshape(1, -1).astype(jnp.float32)
    w2 = proj["w2"]                                  # [F, out_dim]
    b2 = proj["b2"].reshape(1, -1)
    out_dim = w2.shape[1]

    # Pad out_dim to a lane-dense 128 (slice after), tile over the batch.
    Np = _round_up(out_dim, 128)
    w2 = jnp.pad(w2, ((0, 0), (0, Np - out_dim))).astype(jnp.bfloat16)
    b2 = jnp.pad(b2, ((0, 0), (0, Np - out_dim))).astype(jnp.float32)
    tb, Bp = _pick_tile(B, 8, 256)
    hb = jnp.pad(h.astype(jnp.bfloat16), ((0, Bp - B), (0, 0)))

    out = pl.pallas_call(
        _mlp_kernel,
        out_shape=jax.ShapeDtypeStruct((Bp, Np), jnp.float32),
        grid_spec=pltpu.PrefetchScalarGridSpec(
            num_scalar_prefetch=0,
            grid=(Bp // tb,),
            in_specs=[
                pl.BlockSpec((tb, F), lambda i: (i, 0)),
                pl.BlockSpec((F, F), lambda i: (0, 0)),
                pl.BlockSpec((1, F), lambda i: (0, 0)),
                pl.BlockSpec((F, Np), lambda i: (0, 0)),
                pl.BlockSpec((1, Np), lambda i: (0, 0)),
            ],
            out_specs=pl.BlockSpec((tb, Np), lambda i: (i, 0)),
        ),
        compiler_params=_COMPILER_PARAMS_MLP,
    )(hb, w1, b1, w2, b2)
    return out[:B, :out_dim]


def simclr_forward(params, x_i, x_j):
    # Run the two views as one batch: halves kernel launches, doubles M.
    B = x_i.shape[0]
    x = jnp.concatenate([x_i, x_j], axis=0)
    h = encoder_forward(params, x)                 # [2B, 512] f32
    z = proj_head_forward(params["proj"], h)       # [2B, out_dim] f32
    return h[:B], h[B:], z[:B], z[B:]


# ----------------------------------------------------------------------------
# Deterministic parameter init (shapes match torchvision resnet18 + SimCLR head)
# ----------------------------------------------------------------------------
def init_params(key, out_dim):
    keys = iter(jax.random.split(key, 64))

    def conv_w(cout, cin, k):
        return jax.random.normal(next(keys), (cout, cin, k, k), jnp.float32) * 0.05

    def bn(c):
        return dict(gamma=jnp.ones((c,), jnp.float32),
                    beta=jnp.zeros((c,), jnp.float32),
                    mean=jnp.zeros((c,), jnp.float32),
                    var=jnp.ones((c,), jnp.float32))

    params = {"conv1": conv_w(64, 3, 7), "bn1": bn(64)}
    in_c = 64
    layers = []
    for (c, first_stride) in [(64, 1), (128, 2), (256, 2), (512, 2)]:
        blocks = []
        for bi in range(2):
            stride = first_stride if bi == 0 else 1
            blk = dict(
                stride=stride,
                conv1=conv_w(c, in_c, 3), bn1=bn(c),
                conv2=conv_w(c, c, 3), bn2=bn(c),
            )
            if stride != 1 or in_c != c:
                blk["down_conv"] = conv_w(c, in_c, 1)
                blk["down_bn"] = bn(c)
            blocks.append(blk)
            in_c = c
        layers.append(blocks)
    params["layers"] = layers

    in_features = 512  # resnet18 fc.in_features
    params["proj"] = dict(
        w1=jax.random.normal(next(keys), (in_features, in_features), jnp.float32) * 0.03,
        b1=jax.random.normal(next(keys), (in_features,), jnp.float32) * 0.01,
        w2=jax.random.normal(next(keys), (in_features, out_dim), jnp.float32) * 0.03,
        b2=jax.random.normal(next(keys), (out_dim,), jnp.float32) * 0.01,
    )
    return params


# ----------------------------------------------------------------------------
if __name__ == "__main__":
    key = jax.random.PRNGKey(0)
    k_params, k_xi, k_xj = jax.random.split(key, 3)

    out_dim = 16
    params = init_params(k_params, out_dim)

    # Small-but-consistent shapes: batch=2, RGB, 32x32 (spatial reaches 1x1 at layer4).
    x_i = jax.random.normal(k_xi, (2, 3, 32, 32), jnp.float32)
    x_j = jax.random.normal(k_xj, (2, 3, 32, 32), jnp.float32)

    h_i, h_j, z_i, z_j = simclr_forward(params, x_i, x_j)
    jax.block_until_ready((h_i, h_j, z_i, z_j))

    assert h_i.shape == (2, 512) and h_j.shape == (2, 512)
    assert z_i.shape == (2, out_dim) and z_j.shape == (2, out_dim)
    print("KERNEL_OK")
</pallas_src>

<mosaic_0001>
module attributes {stable_mosaic.version = 11 : i64} {
  func.func @_matmul_bn_kernel(%arg0: i32, %arg1: i32, %arg2: i32, %arg3: memref<256x256xbf16, #tpu.memory_space<vmem>>, %arg4: memref<256x128xbf16, #tpu.memory_space<vmem>>, %arg5: memref<1x128xf32, #tpu.memory_space<vmem>>, %arg6: memref<1x128xf32, #tpu.memory_space<vmem>>, %arg7: memref<256x128xbf16, #tpu.memory_space<vmem>>, %arg8: memref<256x128xf32, #tpu.memory_space<vmem>>) attributes {dimension_semantics = [#tpu.dimension_semantics<parallel>, #tpu.dimension_semantics<parallel>, #tpu.dimension_semantics<arbitrary>], iteration_bounds = array<i64: 4, 1, 1>, scalar_prefetch = 0 : i64, scratch_operands = 1 : i64, tpu.core_type = #tpu.core_type<tc>, window_params = [{transform_indices = @transform_0, window_bounds = array<i64: 256, 256>}, {transform_indices = @transform_1, window_bounds = array<i64: 256, 128>}, {transform_indices = @transform_2, window_bounds = array<i64: 1, 128>}, {transform_indices = @transform_3, window_bounds = array<i64: 1, 128>}, {transform_indices = @transform_4, window_bounds = array<i64: 256, 128>}]} {
    %c0_i32 = arith.constant 0 : i32
    %0 = arith.cmpi eq, %arg2, %c0_i32 : i32
    %1 = arith.extui %0 : i1 to i32
    %c0_i32_0 = arith.constant 0 : i32
    %2 = arith.cmpi ne, %1, %c0_i32_0 : i32
    scf.if %2 {
      %cst_10 = arith.constant 0.000000e+00 : f32
      %12 = vector.broadcast %cst_10 : f32 to vector<256x128xf32>
      %c0_11 = arith.constant 0 : index
      %c0_12 = arith.constant 0 : index
      %13 = vector.load %arg8[%c0_11, %c0_12] : memref<256x128xf32, #tpu.memory_space<vmem>>, vector<256x128xf32>
      tpu.vector_store %arg8[%c0_11, %c0_12], %12 {strides = array<i32>} : memref<256x128xf32, #tpu.memory_space<vmem>>, vector<256x128xf32>,
    } else {
    }
    %c0 = arith.constant 0 : index
    %c0_1 = arith.constant 0 : index
    %3 = vector.load %arg8[%c0, %c0_1] : memref<256x128xf32, #tpu.memory_space<vmem>>, vector<256x128xf32>
    %c0_2 = arith.constant 0 : index
    %c0_3 = arith.constant 0 : index
    %4 = vector.load %arg3[%c0_2, %c0_3] : memref<256x256xbf16, #tpu.memory_space<vmem>>, vector<256x256xbf16>
    %c0_4 = arith.constant 0 : index
    %c0_5 = arith.constant 0 : index
    %5 = vector.load %arg4[%c0_4, %c0_5] : memref<256x128xbf16, #tpu.memory_space<vmem>>, vector<256x128xbf16>
    %cst = arith.constant dense<0.000000e+00> : vector<256x128xf32>
    %6 = tpu.matmul %4, %5, %cst {dimension_numbers = #tpu.dot_dimension_numbers<[1], [0], [0], [1], [0, 0, 1, 1], [], []>} : vector<256x256xbf16>, vector<256x128xbf16>, vector<256x128xf32> -> vector<256x128xf32>
    %7 = arith.addf %3, %6 : vector<256x128xf32>
    %c0_6 = arith.constant 0 : index
    %c0_7 = arith.constant 0 : index
    %8 = vector.load %arg8[%c0_6, %c0_7] : memref<256x128xf32, #tpu.memory_space<vmem>>, vector<256x128xf32>
    tpu.vector_store %arg8[%c0_6, %c0_7], %7 {strides = array<i32>} : memref<256x128xf32, #tpu.memory_space<vmem>>, vector<256x128xf32>,
    %c0_i32_8 = arith.constant 0 : i32
    %9 = arith.cmpi eq, %arg2, %c0_i32_8 : i32
    %10 = arith.extui %9 : i1 to i32
    %c0_i32_9 = arith.constant 0 : i32
    %11 = arith.cmpi ne, %10, %c0_i32_9 : i32
    scf.if %11 {
      %c0_10 = arith.constant 0 : index
      %c0_11 = arith.constant 0 : index
      %12 = vector.load %arg8[%c0_10, %c0_11] : memref<256x128xf32, #tpu.memory_space<vmem>>, vector<256x128xf32>
      %c0_12 = arith.constant 0 : index
      %c0_13 = arith.constant 0 : index
      %13 = vector.load %arg5[%c0_12, %c0_13] : memref<1x128xf32, #tpu.memory_space<vmem>>, vector<1x128xf32>
      %14 = vector.broadcast %13 : vector<1x128xf32> to vector<256x128xf32>
      %15 = arith.mulf %12, %14 : vector<256x128xf32>
      %c0_14 = arith.constant 0 : index
      %c0_15 = arith.constant 0 : index
      %16 = vector.load %arg6[%c0_14, %c0_15] : memref<1x128xf32, #tpu.memory_space<vmem>>, vector<1x128xf32>
      %17 = vector.broadcast %16 : vector<1x128xf32> to vector<256x128xf32>
      %18 = arith.addf %15, %17 : vector<256x128xf32>
      %cst_16 = arith.constant 0.000000e+00 : f32
      %19 = vector.broadcast %cst_16 : f32 to vector<256x128xf32>
      %20 = arith.maximumf %18, %19 : vector<256x128xf32>
      %21 = arith.truncf %20 : vector<256x128xf32> to vector<256x128xbf16>
      %c0_17 = arith.constant 0 : index
      %c0_18 = arith.constant 0 : index
      %22 = vector.load %arg7[%c0_17, %c0_18] : memref<256x128xbf16, #tpu.memory_space<vmem>>, vector<256x128xbf16>
      tpu.vector_store %arg7[%c0_17, %c0_18], %21 {strides = array<i32>} : memref<256x128xbf16, #tpu.memory_space<vmem>>, vector<256x128xbf16>,
    } else {
    }
    return
  }
  func.func @transform_0(%arg0: i32, %arg1: i32, %arg2: i32) -> (i32, i32) {
    %c0_i32 = arith.constant 0 : i32
    return %arg0, %arg2 : i32, i32
  }
  func.func @transform_1(%arg0: i32, %arg1: i32, %arg2: i32) -> (i32, i32) {
    %c0_i32 = arith.constant 0 : i32
    return %arg2, %arg1 : i32, i32
  }
  func.func @transform_2(%arg0: i32, %arg1: i32, %arg2: i32) -> (i32, i32) {
    %c0_i32 = arith.constant 0 : i32
    %c0_i32_0 = arith.constant 0 : i32
    return %c0_i32, %arg1 : i32, i32
  }
  func.func @transform_3(%arg0: i32, %arg1: i32, %arg2: i32) -> (i32, i32) {
    %c0_i32 = arith.constant 0 : i32
    %c0_i32_0 = arith.constant 0 : i32
    return %c0_i32, %arg1 : i32, i32
  }
  func.func @transform_4(%arg0: i32, %arg1: i32, %arg2: i32) -> (i32, i32) {
    %c0_i32 = arith.constant 0 : i32
    return %arg0, %arg1 : i32, i32
  }
}

</mosaic_0001>

<bundles_post_ra>
// kernel: tpu_custom_call.1
= control target key start
LH: loop header
LB: loop body
LE: loop exit
PB: predicated region body
PF: predicated region fallthrough
CT: control target
= control target key end

     0   :  { %s2223_s0 = inlined_call_operand.hbm [shape: bf16[1024,256], index: 0, kind: input, shape index: {}]   ;;  %s2224_s1 = inlined_call_operand.hbm [shape: bf16[256,128], index: 1, kind: input, shape index: {}]   ;;  %s2225_s2 = inlined_call_operand.vmem [shape: f32[1,128], index: 2, kind: input, shape index: {}]   ;;  %s2226_s3 = inlined_call_operand.vmem [shape: f32[1,128], index: 3, kind: input, shape index: {}]   ;;  %s2227_s4 = inlined_call_operand.hbm [shape: bf16[1024,128], index: 4, kind: output, shape index: {}]  }
   0x1   :  { %2229 = sst [smem:[#allocation13_spill]] %s2224_s1 }
   0x2   :  { %9 = vsyncpa [#allocation4], 0 }
   0x3   :  { %11 = vsyncpa [#allocation4 + $0x1], 0 }
   0x4   :  { %12 = vsyncpa [#allocation7], 0 }
   0x5   :  { %13 = vsyncpa [#allocation5], 0 }
   0x6   :  { %15 = vsyncpa [#allocation5 + $0x1], 0  ;;  %s1916_s15 = smov 0   ;;  %s1918_s16 = smov 0  }
   0x7   :  { %s1920_s17 = smov 0   ;;  %s1922_s18 = smov 0  }
   0x8   :  { %s1924_s19 = smov 0   ;;  %s1926_s20 = smov 0  }
   0x9 LB: > { %s1281_s21 = sadd.s32 4294967295, %s1882_s20   ;;  %s1282_s22 = sadd.s32 4294967294, %s1882_s20   ;;  %s1882_s20 = sphi %s1926_s20, %s21_s20   ;;  %s1878_s19 = sphi %s1924_s19, %s2244_s19   ;;  %s1874_s18 = sphi %s1922_s18, %s2243_s18   ;;  %s1870_s17 = sphi %s1920_s17, %s2242_s17   ;;  %s1866_s16 = sphi %s1918_s16, %s2241_s16   ;;  %s1862_s15 = sphi %s1916_s15, %s2240_s15  }
   0xa   : > { %p62_p0 = scmp.ne.s32.totalorder %s1866_s16, %s1862_s15  ;;  %p1950_p1 = scmp.eq.s32.totalorder %s1281_s21, 0 }
   0xb   : > { %p1954_p2 = scmp.eq.s32.totalorder %s1281_s21, 3  ;;  %p174_p3 = scmp.eq.s32.totalorder %s1282_s22, 3 }
   0xc   : > { %p1960_p4 = por %p1950_p1, %p62_p0  ;;  %p1283_p5 = scmp.ge.s32.totalorder %s1882_s20, 1 }
   0xd   : > { %p1965_p6 = por %p174_p3, %p62_p0  ;;  %p181_p7 = scmp.lt.s32.totalorder %s1882_s20, 5 }
   0xe   : > { %s2234_s1 = sld [smem:[#allocation13_spill]]  ;;  %s1884_s5 = smov [#allocation6]  }
   0xf   : > { %p1973_p8 = pnand %p1283_p5, %p181_p7  ;;  %s198_s6 = sshll.u32 %s1884_s5, 4  ;;  %s199_s6 = int_to_ptr.vmem [resolvable:$true] %s198_s6 }
  0x10   : > { %s1885_s7 = smov 64   ;;  %s1886_s8 = smov 4  }
  0x11   : > { %p1663_p9 = pneg %p1973_p8  ;;  %s40_s9 = sadd.s32 1, %s1878_s19 }
  0x12   : > { %p42_p11 = scmp.ge.s32.totalorder %s40_s9, 4  ;;  %s49_s10 = sadd.s32 1, %s1870_s17 }
  0x13   : > { %p1664_p10 = pnand %p1663_p9, %p1950_p1  ;;  %p56_p12 = scmp.ne.s32.totalorder %s1870_s17, %s1866_s16 }
  0x14   : > { %s196_s29 = sshll.u32 %s2234_s1, 4  ;;  %p57_p13 = scmp.eq.s32.totalorder %s1882_s20, 0  ;;  %s197_s29 = int_to_ptr.hbm [resolvable:$true] %s196_s29 }
  0x15   : > { %1666 = dma.hbm_to_vmem [thread:$0]  (!%p1664_p10), %s197_s29, 2048, %s199_s6, [#allocation7], %s1885_s7, %s1885_s7, %s1886_s8  }
  0x16   : > { %s2246_s9 = smov (%p42_p11, %s40_s9), 0  ;;  %p1988_p0 = por %p57_p13, %p56_p12 }
  0x17   : > { %2236 = sst [smem:[#allocation12_spill]] %s2246_s9  ;;  %p1994_p3 = por %p1954_p2, %p56_p12 }
  0x18   : > { %s44_s13 = ssub.s32 %s1878_s19, %s2246_s9  ;;  %p1676_p5 = scmp.lt.s32.totalorder %s1882_s20, 4 }
  0x19   : > { %p47_p7 = scmp.eq.s32.totalorder %s44_s13, 0  ;;  %s224_s14 = sand.u32 1, %s1870_s17  }
  0x1a   : > { %s1288_s21 = sshll.u32 %s224_s14, 8  ;;  %s1494_s27 = sshll.u32 %s1878_s19, 8 }
  0x1b   : > { %s2003_s22 = scalar_select %p47_p7, %s1870_s17, %s49_s10  }
  0x1c   : > { %s236_s5 = scalar_lea.hbm %s2223_s0, %s1494_s27  ;;  %s228_s6 = scalar_lea.vmem [#allocation3], %s1288_s21 }
  0x1d   : > { %s239_s7 = sshll.u32 %s228_s6, 4  ;;  %s237_s24 = sshll.u32 %s236_s5, 4  ;;  %s240_s7 = int_to_ptr.vmem [resolvable:$true] %s239_s7  ;;  %s238_s24 = int_to_ptr.hbm [resolvable:$true] %s237_s24 }
  0x1e   : > { %p1668_p2 = pnand %p1676_p5, %p1988_p0  ;;  %s225_s8 = scalar_lea.sflag [#allocation4], %s224_s14 }
  0x1f   : > { %s1887_s1 = smov 128   ;;  %s1888_s9 = smov 8  }
  0x20   : > { %1670 = dma.hbm_to_vmem [thread:$0]  (!%p1668_p2), %s238_s24, 4096, %s240_s7, %s225_s8, %s1887_s1, %s1887_s1, %s1888_s9  }
  0x21   : > { %251 = sbr.rel (%p1973_p8) target bundleno = 340 (0x154), region = 36  ;;  %s2014_s10 = sand.u32 (!%p1973_p8), 1, %s1866_s16  }
  0x22   : > { %s1293_s13 = sshll.u32 (!%p1973_p8), %s2014_s10, 8  ;;  %s254_s21 = scalar_lea.sflag (!%p1973_p8), [#allocation4], %s2014_s10 }
  0x23   : > { %s2018_s27 = scalar_lea.vmem (!%p1973_p8), [#allocation3], %s1293_s13 }
  0x26   : > { %1849 = dma.done.wait (%p1960_p4), %s254_s21, 4096  }
  0x27   : > { %1851 = vsyncadd (%p1960_p4), %s254_s21, 4294963200 }
  0x28   : > { %1853 = dma.done.wait (%p1950_p1), [#allocation7], 2048  }
  0x29   : > { %1855 = vsyncadd (%p1950_p1), [#allocation7], 4294965248  ;;  %v1534_v0 = vld [vmem:[#allocation6 + $0x38] sm:$0xff]  ;;  %v1533_v2 = vld [vmem:[#allocation6 + $0x30] sm:$0xff]  ;;  %s1295_s9 = sshll.u32 %s2014_s10, 7  ;;  %s1543_s14 = sshll.u32 %s1874_s18, 7 }
  0x2a   : > { %v1542_v1 = vld [vmem:[#allocation6 + $0x78] sm:$0xff]  ;;  %692 = vmatpush.bf16.msra.mxu0 %v1534_v0  ;;  %1639 = vmatpush.bf16.msra.mxu2 %v1534_v0  ;;  %v1541_v3 = vld [vmem:[#allocation6 + $0x70] sm:$0xff]  ;;  %v1532_v4 = vld [vmem:[#allocation6 + $0x28] sm:$0xff]  ;;  %s2110_s11 = scalar_lea.vmem [#allocation8], %s1295_s9  ;;  %s1150_s5 = scalar_lea.hbm %s2227_s4, %s1543_s14 }
  0x2b   : > { %781 = vmatpush.bf16.msra.mxu1 %v1542_v1  ;;  %1647 = vmatpush.bf16.msra.mxu3 %v1542_v1  ;;  %v1540_v5 = vld [vmem:[#allocation6 + $0x68] sm:$0xff]  ;;  %v1531_v6 = vld [vmem:[#allocation6 + $0x20] sm:$0xff]  ;;  %v1530_v8 = vld [vmem:[#allocation6 + $0x18] sm:$0xff]  ;;  %s1151_s18 = sshll.u32 %s2110_s11, 4  ;;  %s1153_s6 = sshll.u32 %s1150_s5, 4  ;;  %s1152_s18 = int_to_ptr.vmem [resolvable:$true] %s1151_s18  ;;  %s1154_s6 = int_to_ptr.hbm [resolvable:$true] %s1153_s6 }
  0x2c   : > { %v1539_v7 = vld [vmem:[#allocation6 + $0x60] sm:$0xff]  ;;  %v1538_v9 = vld [vmem:[#allocation6 + $0x58] sm:$0xff]  ;;  %v1529_v10 = vld [vmem:[#allocation6 + $0x10] sm:$0xff]  ;;  %s1138_s7 = scalar_lea.sflag [#allocation5], %s2014_s10  ;;  %s1810_s24 = sshra.s32 %s1154_s6, 4  ;;  %s1811_s24 = int_to_ptr.hbm [resolvable:$true] %s1810_s24 }
  0x2d   : > { %v1537_v11 = vld [vmem:[#allocation6 + $0x50] sm:$0xff]  ;;  %v1528_v12 = vld [vmem:[#allocation6 + $0x8] sm:$0xff]  ;;  %v1527_v14 = vld [vmem:[#allocation6] sm:$0xff]  ;;  %s1812_s8 = scalar_lea.hbm %s1811_s24, 128  ;;  %p1817_p9 = scmp.lt.s32.totalorder %s1811_s24, %s2227_s4 }
  0x2e   : > { %693 = vmatpush.bf16.msra.mxu0 %v1533_v2  ;;  %1640 = vmatpush.bf16.msra.mxu2 %v1533_v2  ;;  %v1536_v13 = vld [vmem:[#allocation6 + $0x48] sm:$0xff]  ;;  %v1535_v15 = vld [vmem:[#allocation6 + $0x40] sm:$0xff]  ;;  %v1306_v28 = vld [vmem:[%s2018_s27 + $0x10] sm:$0xf]  ;;  %p1813_p1 = scmp.ne.s32.totalorder %s1811_s24, %s1812_s8 }
  0x2f   : > { %782 = vmatpush.bf16.msra.mxu1 %v1541_v3  ;;  %1648 = vmatpush.bf16.msra.mxu3 %v1541_v3  ;;  %v1298_v16 = vld [vmem:[%s2018_s27] sm:$0xf]  ;;  %v1496_v17 = vld [vmem:[%s2018_s27 + $0x4] sm:$0xf0]  ;;  %v1495_v20 = vld [vmem:[%s2018_s27 + $0x4] sm:$0xf] }
  0x30   : > { %v1362_v18 = vld [vmem:[%s2018_s27 + $0x80] sm:$0xf]  ;;  %v1512_v19 = vld [vmem:[%s2018_s27 + $0x84] sm:$0xf0]  ;;  %v1300_v21 = vld [vmem:[%s2018_s27 + $0x8] sm:$0xf0]  ;;  %v1299_v24 = vor.u32 %v1496_v17, %v1298_v16  ;;  %p1814_p4 = pnand %p1813_p1, %p1994_p3 }
  0x31   : > { %v1511_v22 = vld [vmem:[%s2018_s27 + $0x84] sm:$0xf]  ;;  %v1364_v23 = vld [vmem:[%s2018_s27 + $0x88] sm:$0xf0]  ;;  %v1363_v25 = vor.u32 %v1512_v19, %v1362_v18  ;;  %v1303_v26 = vor.u32 %v1495_v20, %v1300_v21  ;;  %v1498_v29 = vld [vmem:[%s2018_s27 + $0x14] sm:$0xf0] }
  0x32   : > { %694 = vmatpush.bf16.msra.mxu0 %v1532_v4  ;;  %1641 = vmatpush.bf16.msra.mxu2 %v1532_v4  ;;  %v1367_v27 = vor.u32 %v1511_v22, %v1364_v23  ;;  %v1370_v30 = vld [vmem:[%s2018_s27 + $0x90] sm:$0xf]  ;;  %v1514_v31 = vld [vmem:[%s2018_s27 + $0x94] sm:$0xf0]  ;;  %v1497_v32 = vld [vmem:[%s2018_s27 + $0x14] sm:$0xf]  ;;  %v1307_v36 = vor.u32 %v1498_v29, %v1306_v28  ;;  %p1815_p8 = pneg %p1814_p4 }
  0x33   : > { %783 = vmatpush.bf16.msra.mxu1 %v1540_v5  ;;  %1649 = vmatpush.bf16.msra.mxu3 %v1540_v5  ;;  %v1308_v33 = vld [vmem:[%s2018_s27 + $0x18] sm:$0xf0]  ;;  %v1513_v34 = vld [vmem:[%s2018_s27 + $0x94] sm:$0xf]  ;;  %v1371_v37 = vor.u32 %v1514_v31, %v1370_v30  ;;  %v1314_v40 = vld [vmem:[%s2018_s27 + $0x20] sm:$0xf] }
  0x34   : > { %v1372_v35 = vld [vmem:[%s2018_s27 + $0x98] sm:$0xf0]  ;;  %v1311_v38 = vor.u32 %v1497_v32, %v1308_v33  ;;  %v1500_v41 = vld [vmem:[%s2018_s27 + $0x24] sm:$0xf0]  ;;  %v1378_v42 = vld [vmem:[%s2018_s27 + $0xa0] sm:$0xf] }
  0x35   : > { %v1375_v39 = vor.u32 %v1513_v34, %v1372_v35  ;;  %v1516_v43 = vld [vmem:[%s2018_s27 + $0xa4] sm:$0xf0]  ;;  %v1499_v44 = vld [vmem:[%s2018_s27 + $0x24] sm:$0xf]  ;;  %v1316_v45 = vld [vmem:[%s2018_s27 + $0x28] sm:$0xf0]  ;;  %v1315_v48 = vor.u32 %v1500_v41, %v1314_v40 }
  0x36   : > { %695 = vmatpush.bf16.msra.mxu0 %v1531_v6  ;;  %1642 = vmatpush.bf16.msra.mxu2 %v1531_v6  ;;  %v1515_v46 = vld [vmem:[%s2018_s27 + $0xa4] sm:$0xf]  ;;  %v1380_v47 = vld [vmem:[%s2018_s27 + $0xa8] sm:$0xf0]  ;;  %v1379_v49 = vor.u32 %v1516_v43, %v1378_v42  ;;  %v1319_v50 = vor.u32 %v1499_v44, %v1316_v45  ;;  %v1322_v52 = vld [vmem:[%s2018_s27 + $0x30] sm:$0xf] }
  0x37   : > { %784 = vmatpush.bf16.msra.mxu1 %v1539_v7  ;;  %1650 = vmatpush.bf16.msra.mxu3 %v1539_v7  ;;  %v1383_v51 = vor.u32 %v1515_v46, %v1380_v47  ;;  %v1502_v53 = vld [vmem:[%s2018_s27 + $0x34] sm:$0xf0]  ;;  %v1386_v54 = vld [vmem:[%s2018_s27 + $0xb0] sm:$0xf]  ;;  %v1501_v56 = vld [vmem:[%s2018_s27 + $0x34] sm:$0xf] }
  0x38   : > { %v1518_v55 = vld [vmem:[%s2018_s27 + $0xb4] sm:$0xf0]  ;;  %v1324_v57 = vld [vmem:[%s2018_s27 + $0x38] sm:$0xf0]  ;;  %v1517_v58 = vld [vmem:[%s2018_s27 + $0xb4] sm:$0xf]  ;;  %v1323_v60 = vor.u32 %v1502_v53, %v1322_v52 }
  0x39   : > { %v1388_v59 = vld [vmem:[%s2018_s27 + $0xb8] sm:$0xf0]  ;;  %v1387_v61 = vor.u32 %v1518_v55, %v1386_v54  ;;  %v1327_v62 = vor.u32 %v1501_v56, %v1324_v57  ;;  %v1330_v0 = vld [vmem:[%s2018_s27 + $0x40] sm:$0xf]  ;;  %v1504_v1 = vld [vmem:[%s2018_s27 + $0x44] sm:$0xf0] }
  0x3a   : > { %696 = vmatpush.bf16.msra.mxu0 %v1530_v8  ;;  %1643 = vmatpush.bf16.msra.mxu2 %v1530_v8  ;;  %v1391_v63 = vor.u32 %v1517_v58, %v1388_v59  ;;  %v1394_v2 = vld [vmem:[%s2018_s27 + $0xc0] sm:$0xf]  ;;  %v1520_v3 = vld [vmem:[%s2018_s27 + $0xc4] sm:$0xf0]  ;;  %v1503_v4 = vld [vmem:[%s2018_s27 + $0x44] sm:$0xf]  ;;  %v1331_v8 = vor.u32 %v1504_v1, %v1330_v0 }
  0x3b   : > { %785 = vmatpush.bf16.msra.mxu1 %v1538_v9  ;;  %1651 = vmatpush.bf16.msra.mxu3 %v1538_v9  ;;  %v1332_v5 = vld [vmem:[%s2018_s27 + $0x48] sm:$0xf0]  ;;  %v1519_v6 = vld [vmem:[%s2018_s27 + $0xc4] sm:$0xf]  ;;  %v1395_v9 = vor.u32 %v1520_v3, %v1394_v2  ;;  %v1505_v16 = vld [vmem:[%s2018_s27 + $0x54] sm:$0xf] }
  0x3c   : > { %v1396_v7 = vld [vmem:[%s2018_s27 + $0xc8] sm:$0xf0]  ;;  %v1340_v17 = vld [vmem:[%s2018_s27 + $0x58] sm:$0xf0]  ;;  %v1521_v18 = vld [vmem:[%s2018_s27 + $0xd4] sm:$0xf] }
  0x3d   : > { %v1404_v19 = vld [vmem:[%s2018_s27 + $0xd8] sm:$0xf0]  ;;  %v1343_v22 = vor.u32 %v1505_v16, %v1340_v17  ;;  %v1507_v28 = vld [vmem:[%s2018_s27 + $0x64] sm:$0xf]  ;;  %v1348_v29 = vld [vmem:[%s2018_s27 + $0x68] sm:$0xf0] }
  0x3e   : > { %697 = vmatpush.bf16.msra.mxu0 %v1529_v10  ;;  %1644 = vmatpush.bf16.msra.mxu2 %v1529_v10  ;;  %v1335_v10 = vor.u32 %v1503_v4, %v1332_v5  ;;  %v1407_v23 = vor.u32 %v1521_v18, %v1404_v19  ;;  %v1523_v30 = vld [vmem:[%s2018_s27 + $0xe4] sm:$0xf]  ;;  %v1412_v31 = vld [vmem:[%s2018_s27 + $0xe8] sm:$0xf0]  ;;  %v1351_v34 = vor.u32 %v1507_v28, %v1348_v29  ;;  %v1509_v40 = vld [vmem:[%s2018_s27 + $0x74] sm:$0xf] }
  0x3f   : > { %786 = vmatpush.bf16.msra.mxu1 %v1537_v11  ;;  %1652 = vmatpush.bf16.msra.mxu3 %v1537_v11  ;;  %v1399_v11 = vor.u32 %v1519_v6, %v1396_v7  ;;  %v1415_v35 = vor.u32 %v1523_v30, %v1412_v31  ;;  %v1356_v41 = vld [vmem:[%s2018_s27 + $0x78] sm:$0xf0]  ;;  %v1525_v42 = vld [vmem:[%s2018_s27 + $0xf4] sm:$0xf]  ;;  %v2101_v55 = vld [vmem:[%s2226_s3] ss:$0 sm:$0xff] }
  0x40   : > { %v1420_v43 = vld [vmem:[%s2018_s27 + $0xf8] sm:$0xf0]  ;;  %v1359_v46 = vor.u32 %v1509_v40, %v1356_v41 }
  0x41   : > { %v1423_v47 = vor.u32 %v1525_v42, %v1420_v43 }
  0x42   : > { %698 = vmatpush.bf16.msra.mxu0 %v1528_v12  ;;  %1645 = vmatpush.bf16.msra.mxu2 %v1528_v12  ;;  %v1338_v12 = vld [vmem:[%s2018_s27 + $0x50] sm:$0xf] }
  0x43   : > { %787 = vmatpush.bf16.msra.mxu1 %v1536_v13  ;;  %1653 = vmatpush.bf16.msra.mxu3 %v1536_v13  ;;  %v1506_v13 = vld [vmem:[%s2018_s27 + $0x54] sm:$0xf0] }
  0x44   : > { %v1339_v20 = vor.u32 %v1506_v13, %v1338_v12 }
  0x46   : > { %699 = vmatpush.bf16.msra.mxu0 %v1527_v14  ;;  %1646 = vmatpush.bf16.msra.mxu2 %v1527_v14  ;;  %v1402_v14 = vld [vmem:[%s2018_s27 + $0xd0] sm:$0xf] }
  0x47   : > { %788 = vmatpush.bf16.msra.mxu1 %v1535_v15  ;;  %1654 = vmatpush.bf16.msra.mxu3 %v1535_v15  ;;  %v1522_v15 = vld [vmem:[%s2018_s27 + $0xd4] sm:$0xf0] }
  0x48   : > { %v1403_v21 = vor.u32 %v1522_v15, %v1402_v14 }
  0x49   : > { %700 = vmatmul.bf16.vlgmr.msra.gmra.mxu0 %v1299_v24  ;;  %740 = vmatmul.bf16.vlgmr.msra.gmra.mxu2 %v1363_v25  ;;  %v1346_v24 = vld [vmem:[%s2018_s27 + $0x60] sm:$0xf]  ;;  %v1508_v25 = vld [vmem:[%s2018_s27 + $0x64] sm:$0xf0] }
  0x4a   : > { %789 = vmatmul.bf16.vlgmr.msra.gmra.mxu1 %v1303_v26  ;;  %829 = vmatmul.bf16.vlgmr.msra.gmra.mxu3 %v1367_v27  ;;  %v1410_v26 = vld [vmem:[%s2018_s27 + $0xe0] sm:$0xf]  ;;  %v1524_v27 = vld [vmem:[%s2018_s27 + $0xe4] sm:$0xf0]  ;;  %v1347_v32 = vor.u32 %v1508_v25, %v1346_v24 }
  0x4b   : > { %v1411_v33 = vor.u32 %v1524_v27, %v1410_v26 }
  0x59   : > { %705 = vmatmul.bf16.gmra.mxu0 %v1307_v36  ;;  %745 = vmatmul.bf16.gmra.mxu2 %v1371_v37  ;;  %v1354_v36 = vld [vmem:[%s2018_s27 + $0x70] sm:$0xf]  ;;  %v1510_v37 = vld [vmem:[%s2018_s27 + $0x74] sm:$0xf0] }
  0x5a   : > { %794 = vmatmul.bf16.gmra.mxu1 %v1311_v38  ;;  %834 = vmatmul.bf16.gmra.mxu3 %v1375_v39  ;;  %v1418_v38 = vld [vmem:[%s2018_s27 + $0xf0] sm:$0xf]  ;;  %v1526_v39 = vld [vmem:[%s2018_s27 + $0xf4] sm:$0xf0]  ;;  %v1355_v44 = vor.u32 %v1510_v37, %v1354_v36  ;;  %s1816_s27 = scalar_lea.hbm %s2227_s4, 512 }
  0x5b   : > { %v1419_v45 = vor.u32 %v1526_v39, %v1418_v38  ;;  %p1818_p10 = scmp.lt.s32.totalorder %s1816_s27, %s1812_s8 }
  0x5d   : > { %p1819_p11 = por %p1818_p10, %p1817_p9 }
  0x5f   : > { %p1820_p12 = pnand %p1819_p11, %p1815_p8 }
  0x69   : > { %710 = vmatmul.bf16.gmra.mxu0 %v1315_v48  ;;  %750 = vmatmul.bf16.gmra.mxu2 %v1379_v49 }
  0x6a   : > { %799 = vmatmul.bf16.gmra.mxu1 %v1319_v50  ;;  %839 = vmatmul.bf16.gmra.mxu3 %v1383_v51  ;;  %v2095_v51 = vld [vmem:[%s2225_s2] ss:$0 sm:$0xff] }
  0x79   : > { %715 = vmatmul.bf16.gmra.mxu0 %v1323_v60  ;;  %755 = vmatmul.bf16.gmra.mxu2 %v1387_v61 }
  0x7a   : > { %804 = vmatmul.bf16.gmra.mxu1 %v1327_v62  ;;  %844 = vmatmul.bf16.gmra.mxu3 %v1391_v63 }
  0x89   : > { %720 = vmatmul.bf16.gmra.mxu0 %v1331_v8  ;;  %760 = vmatmul.bf16.gmra.mxu2 %v1395_v9 }
  0x8a   : > { %809 = vmatmul.bf16.gmra.mxu1 %v1335_v10  ;;  %849 = vmatmul.bf16.gmra.mxu3 %v1399_v11 }
  0x99   : > { %725 = vmatmul.bf16.gmra.mxu0 %v1339_v20  ;;  %765 = vmatmul.bf16.gmra.mxu2 %v1403_v21 }
  0x9a   : > { %814 = vmatmul.bf16.gmra.mxu1 %v1343_v22  ;;  %854 = vmatmul.bf16.gmra.mxu3 %v1407_v23 }
  0xa9   : > { %730 = vmatmul.bf16.gmra.mxu0 %v1347_v32  ;;  %770 = vmatmul.bf16.gmra.mxu2 %v1411_v33 }
  0xaa   : > { %819 = vmatmul.bf16.gmra.mxu1 %v1351_v34  ;;  %859 = vmatmul.bf16.gmra.mxu3 %v1415_v35 }
  0xb9   : > { %735 = vmatmul.bf16.gmra.mxu0 %v1355_v44  ;;  %775 = vmatmul.bf16.gmra.mxu2 %v1419_v45 }
  0xba   : > { %824 = vmatmul.bf16.gmra.mxu1 %v1359_v46  ;;  %864 = vmatmul.bf16.gmra.mxu3 %v1423_v47 }
  0xc6   : > { %v701_v48 = vpop.f32.mrf.mxu0 }
  0xc7   : > { %v790_v49 = vpop.f32.mrf.mxu1 }
  0xc8   : > { %v791_v50 = vadd.f32 %v790_v49, %v701_v48 }
  0xca   : > { %v973_v54 = vmul.f32 %v2095_v51, %v791_v50 }
  0xcc   : > { %v741_v52 = vpop.f32.mrf.mxu2  ;;  %v1009_v60 = vadd.f32 %v2101_v55, %v973_v54 }
  0xcd   : > { %v830_v53 = vpop.f32.mrf.mxu3 }
  0xce   : > { %v703_v56 = vpop.f32.mrf.mxu0  ;;  %v831_v58 = vadd.f32 %v830_v53, %v741_v52  ;;  %v1041_v2 = vmax.f32 %v1009_v60, 0.0 }
  0xcf   : > { %v792_v57 = vpop.f32.mrf.mxu1 }
  0xd0   : > { %v793_v59 = vadd.f32 %v792_v57, %v703_v56  ;;  %v989_v62 = vmul.f32 %v2095_v51, %v831_v58 }
  0xd2   : > { %v974_v61 = vmul.f32 %v2095_v51, %v793_v59  ;;  %v1025_v7 = vadd.f32 %v2101_v55, %v989_v62 }
  0xd4   : > { %v1010_v63 = vadd.f32 %v2101_v55, %v974_v61  ;;  %v743_v0 = vpop.f32.mrf.mxu2  ;;  %v1057_v12 = vmax.f32 %v1025_v7, 0.0 }
  0xd5   : > { %v832_v1 = vpop.f32.mrf.mxu3 }
  0xd6   : > { %v1042_v3 = vmax.f32 %v1010_v63, 0.0  ;;  %v833_v4 = vadd.f32 %v832_v1, %v743_v0  ;;  %v706_v5 = vpop.f32.mrf.mxu0 }
  0xd7   : > { %v795_v6 = vpop.f32.mrf.mxu1 }
  0xd8   : > { %v1547_v8 = vpack.c.bf16 %v1042_v3, %v1041_v2  ;;  %v990_v9 = vmul.f32 %v2095_v51, %v833_v4  ;;  %v796_v11 = vadd.f32 %v795_v6, %v706_v5 }
  0xda   : > { %1548 = vst [vmem:[%s2110_s11] sm:$0xff] %v1547_v8   ;;  %v1026_v10 = vadd.f32 %v2101_v55, %v990_v9  ;;  %v975_v17 = vmul.f32 %v2095_v51, %v796_v11 }
  0xdc   : > { %v1058_v13 = vmax.f32 %v1026_v10, 0.0  ;;  %v746_v14 = vpop.f32.mrf.mxu2  ;;  %v1011_v22 = vadd.f32 %v2101_v55, %v975_v17 }
  0xdd   : > { %v835_v15 = vpop.f32.mrf.mxu3 }
  0xde   : > { %v1587_v16 = vpack.c.bf16 %v1058_v13, %v1057_v12  ;;  %v708_v18 = vpop.f32.mrf.mxu0  ;;  %v836_v20 = vadd.f32 %v835_v15, %v746_v14  ;;  %v1043_v28 = vmax.f32 %v1011_v22, 0.0 }
  0xdf   : > { %v797_v19 = vpop.f32.mrf.mxu1 }
  0xe0   : > { %1631 = vst [vmem:[%s2110_s11 + $0x40] sm:$0xff] %v1587_v16   ;;  %v798_v21 = vadd.f32 %v797_v19, %v708_v18  ;;  %v991_v24 = vmul.f32 %v2095_v51, %v836_v20 }
  0xe2   : > { %v976_v23 = vmul.f32 %v2095_v51, %v798_v21  ;;  %v1027_v33 = vadd.f32 %v2101_v55, %v991_v24 }
  0xe4   : > { %v1012_v25 = vadd.f32 %v2101_v55, %v976_v23  ;;  %v748_v26 = vpop.f32.mrf.mxu2  ;;  %v1059_v38 = vmax.f32 %v1027_v33, 0.0 }
  0xe5   : > { %v837_v27 = vpop.f32.mrf.mxu3 }
  0xe6   : > { %v1044_v29 = vmax.f32 %v1012_v25, 0.0  ;;  %v838_v30 = vadd.f32 %v837_v27, %v748_v26  ;;  %v711_v31 = vpop.f32.mrf.mxu0 }
  0xe7   : > { %v800_v32 = vpop.f32.mrf.mxu1 }
  0xe8   : > { %v1552_v34 = vpack.c.bf16 %v1044_v29, %v1043_v28  ;;  %v992_v35 = vmul.f32 %v2095_v51, %v838_v30  ;;  %v801_v37 = vadd.f32 %v800_v32, %v711_v31 }
  0xea   : > { %1624 = vst [vmem:[%s2110_s11 + $0x8] sm:$0xff] %v1552_v34   ;;  %v1028_v36 = vadd.f32 %v2101_v55, %v992_v35  ;;  %v977_v43 = vmul.f32 %v2095_v51, %v801_v37 }
  0xec   : > { %v1060_v39 = vmax.f32 %v1028_v36, 0.0  ;;  %v751_v40 = vpop.f32.mrf.mxu2  ;;  %v1013_v48 = vadd.f32 %v2101_v55, %v977_v43 }
  0xed   : > { %v840_v41 = vpop.f32.mrf.mxu3 }
  0xee   : > { %v1592_v42 = vpack.c.bf16 %v1060_v39, %v1059_v38  ;;  %v713_v44 = vpop.f32.mrf.mxu0  ;;  %v841_v46 = vadd.f32 %v840_v41, %v751_v40  ;;  %v1045_v56 = vmax.f32 %v1013_v48, 0.0 }
  0xef   : > { %v802_v45 = vpop.f32.mrf.mxu1 }
  0xf0   : > { %1632 = vst [vmem:[%s2110_s11 + $0x48] sm:$0xff] %v1592_v42   ;;  %v803_v47 = vadd.f32 %v802_v45, %v713_v44  ;;  %v993_v50 = vmul.f32 %v2095_v51, %v841_v46 }
  0xf2   : > { %v978_v49 = vmul.f32 %v2095_v51, %v803_v47  ;;  %v1029_v61 = vadd.f32 %v2101_v55, %v993_v50 }
  0xf4   : > { %v1014_v52 = vadd.f32 %v2101_v55, %v978_v49  ;;  %v753_v53 = vpop.f32.mrf.mxu2  ;;  %v1061_v2 = vmax.f32 %v1029_v61, 0.0 }
  0xf5   : > { %v842_v54 = vpop.f32.mrf.mxu3 }
  0xf6   : > { %v1046_v57 = vmax.f32 %v1014_v52, 0.0  ;;  %v843_v58 = vadd.f32 %v842_v54, %v753_v53  ;;  %v716_v59 = vpop.f32.mrf.mxu0 }
  0xf7   : > { %v805_v60 = vpop.f32.mrf.mxu1 }
  0xf8   : > { %v1557_v62 = vpack.c.bf16 %v1046_v57, %v1045_v56  ;;  %v994_v63 = vmul.f32 %v2095_v51, %v843_v58  ;;  %v806_v1 = vadd.f32 %v805_v60, %v716_v59 }
  0xfa   : > { %1625 = vst [vmem:[%s2110_s11 + $0x10] sm:$0xff] %v1557_v62   ;;  %v1030_v0 = vadd.f32 %v2101_v55, %v994_v63  ;;  %v979_v7 = vmul.f32 %v2095_v51, %v806_v1 }
  0xfc   : > { %v1062_v3 = vmax.f32 %v1030_v0, 0.0  ;;  %v756_v4 = vpop.f32.mrf.mxu2  ;;  %v1015_v12 = vadd.f32 %v2101_v55, %v979_v7 }
  0xfd   : > { %v845_v5 = vpop.f32.mrf.mxu3 }
  0xfe   : > { %v1597_v6 = vpack.c.bf16 %v1062_v3, %v1061_v2  ;;  %v718_v8 = vpop.f32.mrf.mxu0  ;;  %v846_v10 = vadd.f32 %v845_v5, %v756_v4  ;;  %v1047_v18 = vmax.f32 %v1015_v12, 0.0 }
  0xff   : > { %v807_v9 = vpop.f32.mrf.mxu1 }
 0x100   : > { %1633 = vst [vmem:[%s2110_s11 + $0x50] sm:$0xff] %v1597_v6   ;;  %v808_v11 = vadd.f32 %v807_v9, %v718_v8  ;;  %v995_v14 = vmul.f32 %v2095_v51, %v846_v10 }
 0x102   : > { %v980_v13 = vmul.f32 %v2095_v51, %v808_v11  ;;  %v1031_v23 = vadd.f32 %v2101_v55, %v995_v14 }
 0x104   : > { %v1016_v15 = vadd.f32 %v2101_v55, %v980_v13  ;;  %v758_v16 = vpop.f32.mrf.mxu2  ;;  %v1063_v28 = vmax.f32 %v1031_v23, 0.0 }
 0x105   : > { %v847_v17 = vpop.f32.mrf.mxu3 }
 0x106   : > { %v1048_v19 = vmax.f32 %v1016_v15, 0.0  ;;  %v848_v20 = vadd.f32 %v847_v17, %v758_v16  ;;  %v721_v21 = vpop.f32.mrf.mxu0 }
 0x107   : > { %v810_v22 = vpop.f32.mrf.mxu1 }
 0x108   : > { %v1562_v24 = vpack.c.bf16 %v1048_v19, %v1047_v18  ;;  %v996_v25 = vmul.f32 %v2095_v51, %v848_v20  ;;  %v811_v27 = vadd.f32 %v810_v22, %v721_v21 }
 0x10a   : > { %1626 = vst [vmem:[%s2110_s11 + $0x18] sm:$0xff] %v1562_v24   ;;  %v1032_v26 = vadd.f32 %v2101_v55, %v996_v25  ;;  %v981_v33 = vmul.f32 %v2095_v51, %v811_v27 }
 0x10c   : > { %v1064_v29 = vmax.f32 %v1032_v26, 0.0  ;;  %v761_v30 = vpop.f32.mrf.mxu2  ;;  %v1017_v38 = vadd.f32 %v2101_v55, %v981_v33 }
 0x10d   : > { %v850_v31 = vpop.f32.mrf.mxu3 }
 0x10e   : > { %v1602_v32 = vpack.c.bf16 %v1064_v29, %v1063_v28  ;;  %v723_v34 = vpop.f32.mrf.mxu0  ;;  %v851_v36 = vadd.f32 %v850_v31, %v761_v30  ;;  %v1049_v44 = vmax.f32 %v1017_v38, 0.0 }
 0x10f   : > { %v812_v35 = vpop.f32.mrf.mxu1 }
 0x110   : > { %1634 = vst [vmem:[%s2110_s11 + $0x58] sm:$0xff] %v1602_v32   ;;  %v813_v37 = vadd.f32 %v812_v35, %v723_v34  ;;  %v997_v40 = vmul.f32 %v2095_v51, %v851_v36 }
 0x112   : > { %v982_v39 = vmul.f32 %v2095_v51, %v813_v37  ;;  %v1033_v49 = vadd.f32 %v2101_v55, %v997_v40 }
 0x114   : > { %v1018_v41 = vadd.f32 %v2101_v55, %v982_v39  ;;  %v763_v42 = vpop.f32.mrf.mxu2  ;;  %v1065_v56 = vmax.f32 %v1033_v49, 0.0 }
 0x115   : > { %v852_v43 = vpop.f32.mrf.mxu3 }
 0x116   : > { %v1050_v45 = vmax.f32 %v1018_v41, 0.0  ;;  %v853_v46 = vadd.f32 %v852_v43, %v763_v42  ;;  %v726_v47 = vpop.f32.mrf.mxu0 }
 0x117   : > { %v815_v48 = vpop.f32.mrf.mxu1 }
 0x118   : > { %v1567_v50 = vpack.c.bf16 %v1050_v45, %v1049_v44  ;;  %v998_v52 = vmul.f32 %v2095_v51, %v853_v46  ;;  %v816_v54 = vadd.f32 %v815_v48, %v726_v47 }
 0x11a   : > { %1627 = vst [vmem:[%s2110_s11 + $0x20] sm:$0xff] %v1567_v50   ;;  %v1034_v53 = vadd.f32 %v2101_v55, %v998_v52  ;;  %v983_v61 = vmul.f32 %v2095_v51, %v816_v54 }
 0x11c   : > { %v1066_v57 = vmax.f32 %v1034_v53, 0.0  ;;  %v766_v58 = vpop.f32.mrf.mxu2  ;;  %v1019_v2 = vadd.f32 %v2101_v55, %v983_v61 }
 0x11d   : > { %v855_v59 = vpop.f32.mrf.mxu3 }
 0x11e   : > { %v1607_v60 = vpack.c.bf16 %v1066_v57, %v1065_v56  ;;  %v728_v62 = vpop.f32.mrf.mxu0  ;;  %v856_v0 = vadd.f32 %v855_v59, %v766_v58  ;;  %v1051_v8 = vmax.f32 %v1019_v2, 0.0 }
 0x11f   : > { %v817_v63 = vpop.f32.mrf.mxu1 }
 0x120   : > { %1635 = vst [vmem:[%s2110_s11 + $0x60] sm:$0xff] %v1607_v60   ;;  %v818_v1 = vadd.f32 %v817_v63, %v728_v62  ;;  %v999_v4 = vmul.f32 %v2095_v51, %v856_v0 }
 0x122   : > { %v984_v3 = vmul.f32 %v2095_v51, %v818_v1  ;;  %v1035_v13 = vadd.f32 %v2101_v55, %v999_v4 }
 0x124   : > { %v1020_v5 = vadd.f32 %v2101_v55, %v984_v3  ;;  %v768_v6 = vpop.f32.mrf.mxu2  ;;  %v1067_v18 = vmax.f32 %v1035_v13, 0.0 }
 0x125   : > { %v857_v7 = vpop.f32.mrf.mxu3 }
 0x126   : > { %v1052_v9 = vmax.f32 %v1020_v5, 0.0  ;;  %v858_v10 = vadd.f32 %v857_v7, %v768_v6  ;;  %v731_v11 = vpop.f32.mrf.mxu0 }
 0x127   : > { %v820_v12 = vpop.f32.mrf.mxu1 }
 0x128   : > { %v1572_v14 = vpack.c.bf16 %v1052_v9, %v1051_v8  ;;  %v1000_v15 = vmul.f32 %v2095_v51, %v858_v10  ;;  %v821_v17 = vadd.f32 %v820_v12, %v731_v11 }
 0x12a   : > { %1628 = vst [vmem:[%s2110_s11 + $0x28] sm:$0xff] %v1572_v14   ;;  %v1036_v16 = vadd.f32 %v2101_v55, %v1000_v15  ;;  %v985_v23 = vmul.f32 %v2095_v51, %v821_v17 }
 0x12c   : > { %v1068_v19 = vmax.f32 %v1036_v16, 0.0  ;;  %v771_v20 = vpop.f32.mrf.mxu2  ;;  %v1021_v28 = vadd.f32 %v2101_v55, %v985_v23 }
 0x12d   : > { %v860_v21 = vpop.f32.mrf.mxu3 }
 0x12e   : > { %v1612_v22 = vpack.c.bf16 %v1068_v19, %v1067_v18  ;;  %v733_v24 = vpop.f32.mrf.mxu0  ;;  %v861_v26 = vadd.f32 %v860_v21, %v771_v20  ;;  %v1053_v34 = vmax.f32 %v1021_v28, 0.0 }
 0x12f   : > { %v822_v25 = vpop.f32.mrf.mxu1 }
 0x130   : > { %1636 = vst [vmem:[%s2110_s11 + $0x68] sm:$0xff] %v1612_v22   ;;  %v823_v27 = vadd.f32 %v822_v25, %v733_v24  ;;  %v1001_v30 = vmul.f32 %v2095_v51, %v861_v26 }
 0x132   : > { %v986_v29 = vmul.f32 %v2095_v51, %v823_v27  ;;  %v1037_v39 = vadd.f32 %v2101_v55, %v1001_v30 }
 0x134   : > { %v1022_v31 = vadd.f32 %v2101_v55, %v986_v29  ;;  %v773_v32 = vpop.f32.mrf.mxu2  ;;  %v1069_v44 = vmax.f32 %v1037_v39, 0.0 }
 0x135   : > { %v862_v33 = vpop.f32.mrf.mxu3 }
 0x136   : > { %v1054_v35 = vmax.f32 %v1022_v31, 0.0  ;;  %v863_v36 = vadd.f32 %v862_v33, %v773_v32  ;;  %v736_v37 = vpop.f32.mrf.mxu0 }
 0x137   : > { %v825_v38 = vpop.f32.mrf.mxu1 }
 0x138   : > { %v1577_v40 = vpack.c.bf16 %v1054_v35, %v1053_v34  ;;  %v1002_v41 = vmul.f32 %v2095_v51, %v863_v36  ;;  %v826_v43 = vadd.f32 %v825_v38, %v736_v37 }
 0x13a   : > { %1629 = vst [vmem:[%s2110_s11 + $0x30] sm:$0xff] %v1577_v40   ;;  %v1038_v42 = vadd.f32 %v2101_v55, %v1002_v41  ;;  %v987_v49 = vmul.f32 %v2095_v51, %v826_v43 }
 0x13c   : > { %v1070_v45 = vmax.f32 %v1038_v42, 0.0  ;;  %v776_v46 = vpop.f32.mrf.mxu2  ;;  %v1023_v56 = vadd.f32 %v2101_v55, %v987_v49 }
 0x13d   : > { %v865_v47 = vpop.f32.mrf.mxu3 }
 0x13e   : > { %v1617_v48 = vpack.c.bf16 %v1070_v45, %v1069_v44  ;;  %v738_v50 = vpop.f32.mrf.mxu0  ;;  %v866_v53 = vadd.f32 %v865_v47, %v776_v46  ;;  %v1055_v62 = vmax.f32 %v1023_v56, 0.0 }
 0x13f   : > { %v827_v52 = vpop.f32.mrf.mxu1 }
 0x140   : > { %1637 = vst [vmem:[%s2110_s11 + $0x70] sm:$0xff] %v1617_v48   ;;  %v828_v54 = vadd.f32 %v827_v52, %v738_v50  ;;  %v1003_v58 = vmul.f32 %v2095_v51, %v866_v53 }
 0x142   : > { %v988_v57 = vmul.f32 %v2095_v51, %v828_v54  ;;  %v1039_v1 = vadd.f32 %v2101_v55, %v1003_v58 }
 0x144   : > { %v1024_v59 = vadd.f32 %v2101_v55, %v988_v57  ;;  %v778_v60 = vpop.f32.mrf.mxu2  ;;  %v1071_v5 = vmax.f32 %v1039_v1, 0.0 }
 0x145   : > { %v867_v61 = vpop.f32.mrf.mxu3 }
 0x146   : > { %v1056_v63 = vmax.f32 %v1024_v59, 0.0  ;;  %v868_v0 = vadd.f32 %v867_v61, %v778_v60 }
 0x148   : > { %v1582_v2 = vpack.c.bf16 %v1056_v63, %v1055_v62  ;;  %v1004_v3 = vmul.f32 %v2095_v51, %v868_v0 }
 0x14a   : > { %1630 = vst [vmem:[%s2110_s11 + $0x38] sm:$0xff] %v1582_v2   ;;  %v1040_v4 = vadd.f32 %v2101_v55, %v1004_v3 }
 0x14c   : > { %v1072_v6 = vmax.f32 %v1040_v4, 0.0 }
 0x14e   : > { %v1622_v7 = vpack.c.bf16 %v1072_v6, %v1071_v5 }
 0x150   : > { %1638 = vst [vmem:[%s2110_s11 + $0x78] sm:$0xff] %v1622_v7  }
 0x151   : > { %1823 = shalt.err (!%p1820_p12)
}
 0x152   : > { %s1889_s10 = smov 64   ;;  %s1890_s25 = smov 4  }
 0x153   : > { %1661 = dma.vmem_to_hbm [thread:$0]  (%p1994_p3), %s1152_s18, 2048, %s1154_s6, %s1138_s7, %s1889_s10, %s1889_s10, %s1890_s25  }
 0x154 PF: > { %p1678_p13 = scmp.ge.s32.totalorder %s1882_s20, 2  ;;  %s1168_s30 = sand.u32 1, %s1862_s15  }
 0x155   : > { %s1169_s9 = scalar_lea.sflag [#allocation5], %s1168_s30 }
 0x156   : > { %p1672_p0 = pnand %p1678_p13, %p1965_p6 }
 0x158   : > { %p1673_p5 = pneg %p1672_p0 }
 0x15a   : > { %1857 = dma.done.wait (%p1673_p5), %s1169_s9, 2048  }
 0x15b   : > { %1859 = vsyncadd (%p1673_p5), %s1169_s9, 4294965248  ;;  %s21_s20 = sadd.s32 1, %s1882_s20   ;;  %s2239_s12 = sld [smem:[#allocation12_spill]] }
 0x15c   : > { %p18_p7 = scmp.ge.s32.totalorder %s21_s20, 6   ;;  %s2240_s15 = smov %s1866_s16 }
 0x15d   : > { %s2241_s16 = smov %s1870_s17  ;;  %s2242_s17 = smov %s2003_s22 }
 0x15e   : > { %s2243_s18 = smov %s1878_s19  ;;  %20 = sbr.rel (!%p18_p7) target bundleno = 9 (0x9), region = 100 }
 0x161   : > { %s2244_s19 = smov %s2239_s12 }
 0x163   :  { %1175 = vsyncpa [#allocation4], 1 }
 0x164   :  { %1177 = vsyncpa [#allocation4 + $0x1], 1 }
 0x165   :  { %1178 = vsyncpa [#allocation7], 1 }
 0x166   :  { %1179 = vsyncpa [#allocation5], 1 }
 0x167   :  { %1181 = vsyncpa [#allocation5 + $0x1], 1 }

</bundles_post_ra>
